<compile_context>
chip_gen: v5e
topology: v5e:2x2
jax: 0.10.0
libtpu: 0.0.40
codegen_flags: <defaults>
</compile_context>

<pallas_src>
import math

import jax
import jax.numpy as jnp
from jax.experimental import pallas as pl
from jax.experimental.pallas import tpu as pltpu

BN_EPS = 1e-5
_LANE = 128
_SUBLANE = 8


def _round_up(x, m):
    return ((x + m - 1) // m) * m


def _vmem_capacity_bytes():
    try:
        return int(pltpu.get_tpu_info().vmem_capacity_bytes)
    except Exception:
        return 64 << 20  # conservative fallback (v7x per-TC VMEM)


# ----------------------------------------------------------------------------
# Kernel
# ----------------------------------------------------------------------------
def _make_kernel(num_hidden, compute_dtype):
    """Fused MLP kernel.

    Per hidden layer: Linear (MXU, optional bf16 operands, f32 accumulation),
    ReLU (VPU), eval-mode BatchNorm as f32 scale/shift (VPU). Dropout = identity.
    Head: exact f32 row contraction, stored batch-in-lanes as a (1, tb) block.
    """

    def kernel(*refs):
        x_ref = refs[0]
        o_ref = refs[-1]
        p = refs[1:-1]  # [W,b,scale,shift] * num_hidden + [w_head_row, b_head]

        h = x_ref[...]  # (tb, D) f32
        for l in range(num_hidden):
            w = p[4 * l][...]          # (prev_pad, n_pad)  compute_dtype
            b = p[4 * l + 1][...]      # (1, n_pad)         f32
            scale = p[4 * l + 2][...]  # (1, n_pad)         f32
            shift = p[4 * l + 3][...]  # (1, n_pad)         f32
            h = jnp.dot(h.astype(compute_dtype), w,
                        preferred_element_type=jnp.float32) + b
            h = jnp.maximum(h, 0.0)          # ReLU
            h = h * scale + shift            # eval-mode BatchNorm1d
            # Dropout(0.2) is identity in eval mode.

        w_head = p[4 * num_hidden][...]      # (1, prev_pad) f32
        b_head = p[4 * num_hidden + 1][...]  # (1, 1)        f32
        y = jnp.sum(h * w_head, axis=-1, keepdims=True)       # (tb, 1) exact f32
        # Small XLU relayout: batch moves from sublanes to lanes for a dense store.
        o_ref[...] = (jnp.transpose(y) + b_head).astype(o_ref.dtype)  # (1, tb)

    return kernel


# ----------------------------------------------------------------------------
# Parameter handling
# ----------------------------------------------------------------------------
def init_params(key, input_dim, hidden_dims):
    """PyTorch-style init (uniform +-1/sqrt(fan_in) for Linear; gamma=1, beta=0
    for BatchNorm1d). Running stats made non-trivial so the general eval-BN path
    (mean != 0, var != 1) is exercised."""
    hidden = []
    prev = input_dim
    for dim in hidden_dims:
        key, kw, kb, km, kv = jax.random.split(key, 5)
        bound = 1.0 / math.sqrt(prev)
        hidden.append(dict(
            w=jax.random.uniform(kw, (prev, dim), jnp.float32, -bound, bound),
            b=jax.random.uniform(kb, (dim,), jnp.float32, -bound, bound),
            gamma=jnp.ones((dim,), jnp.float32),
            beta=jnp.zeros((dim,), jnp.float32),
            mean=0.1 * jax.random.normal(km, (dim,), jnp.float32),
            var=1.0 + 0.1 * jax.random.uniform(kv, (dim,), jnp.float32),
        ))
        prev = dim
    key, kw, kb = jax.random.split(key, 3)
    bound = 1.0 / math.sqrt(prev)
    w_out = jax.random.uniform(kw, (prev, 1), jnp.float32, -bound, bound)
    b_out = jax.random.uniform(kb, (1,), jnp.float32, -bound, bound)
    return {"hidden": hidden, "out": (w_out, b_out)}


def prepare_params(raw, compute_dtype=jnp.float32):
    """One-time parameter prep:
      * Zero-pad every hidden width to a multiple of 128 lanes.
      * Precompute eval-BN scale/shift per channel, kept in f32 (applied on the
        VPU after ReLU; not folded into bf16 weights -> no precision loss).
      * Cast Linear weights to the MXU compute dtype (bf16 on any generation is
        fine: MXU-native, halves resident weight VMEM); biases/BN stay f32.
      * Head kept as an f32 (1, prev_pad) row + (1,1) bias (no 128-wide padding).
    """
    hidden = raw["hidden"]
    w_out, b_out = raw["out"]
    input_dim = hidden[0]["w"].shape[0] if hidden else w_out.shape[0]

    flat = []
    prev_pad = input_dim  # x keeps its native feature width (block = full dim)
    for h in hidden:
        w = h["w"].astype(jnp.float32)
        b = h["b"].astype(jnp.float32)
        k, n = w.shape
        n_pad = _round_up(n, _LANE)
        w_p = jnp.zeros((prev_pad, n_pad), jnp.float32).at[:k, :n].set(w)
        b_p = jnp.zeros((1, n_pad), jnp.float32).at[0, :n].set(b)
        inv = 1.0 / jnp.sqrt(h["var"].astype(jnp.float32) + BN_EPS)
        scale = h["gamma"].astype(jnp.float32) * inv
        shift = h["beta"].astype(jnp.float32) - h["mean"].astype(jnp.float32) * scale
        s_p = jnp.zeros((1, n_pad), jnp.float32).at[0, :n].set(scale)
        t_p = jnp.zeros((1, n_pad), jnp.float32).at[0, :n].set(shift)
        flat += [w_p.astype(compute_dtype), b_p, s_p, t_p]
        prev_pad = n_pad

    k = w_out.shape[0]
    w_row = jnp.zeros((1, prev_pad), jnp.float32).at[0, :k].set(
        w_out[:, 0].astype(jnp.float32))
    b_row = jnp.asarray(b_out, jnp.float32).reshape(1, 1)
    flat += [w_row, b_row]

    return {"flat": flat, "compute_dtype": compute_dtype,
            "input_dim": input_dim, "num_hidden": len(hidden)}


# ----------------------------------------------------------------------------
# Wrapper
# ----------------------------------------------------------------------------
def metabolic_cost_net_forward(x, prepared, *, block_b=2048):
    """x: (B, input_dim). Returns (B, 1) float32."""
    flat = prepared["flat"]
    compute_dtype = prepared["compute_dtype"]
    num_hidden = prepared["num_hidden"]

    B, D = x.shape
    assert D == prepared["input_dim"], (D, prepared["input_dim"])
    x = x.astype(jnp.float32)

    widest = max(a.shape[-1] for a in flat)
    param_bytes = sum(a.size * a.dtype.itemsize for a in flat)
    cap = int(0.8 * _vmem_capacity_bytes())  # generation-aware VMEM budget

    # ---- batch tile -------------------------------------------------------
    if B <= 2 * _LANE:
        # Single tile; block dims == array dims so no padding / partial blocks.
        tb = B
    else:
        # Lane-aligned tile (lane-dense output block), at least 2 grid steps so
        # v7x can shard batch tiles across both TensorCores.
        tb = min(_round_up(block_b, _LANE), _round_up(pl.cdiv(B, 2), _LANE))
        # Keep streamed VMEM (x blocks, activations, output) inside the budget.
        per_row = (2 * D + 4 * widest + 2) * 4
        avail = max(int(0.6 * cap) - 2 * param_bytes, per_row * _LANE)
        tb = max(_LANE, min(tb, (avail // per_row) // _LANE * _LANE))
    grid_steps = pl.cdiv(B, tb)
    b_pad = grid_steps * tb  # output is allocated padded; x is NOT padded.

    stream_bytes = (2 * tb * D + 2 * tb + 4 * tb * widest) * 4
    need = 2 * param_bytes + stream_bytes
    vmem_limit = int(min(max(2 * need, 16 << 20), cap))

    def _run(use_buffered):
        def _param_spec(shape):
            if use_buffered:
                # Constant block index -> single resident buffer, no double-buffer.
                return pl.BlockSpec(shape, lambda i: (0, 0),
                                    pipeline_mode=pl.Buffered(1))
            return pl.BlockSpec(shape, lambda i: (0, 0))

        in_specs = [pl.BlockSpec((tb, D), lambda i: (i, 0))]       # streamed x
        in_specs += [_param_spec(a.shape) for a in flat]            # resident params
        out_spec = pl.BlockSpec((1, tb), lambda i: (0, i))          # batch in lanes

        return pl.pallas_call(
            _make_kernel(num_hidden, compute_dtype),
            out_shape=jax.ShapeDtypeStruct((1, b_pad), jnp.float32),
            grid=(grid_steps,),
            in_specs=in_specs,
            out_specs=out_spec,
            compiler_params=pltpu.CompilerParams(
                dimension_semantics=("parallel",),
                vmem_limit_bytes=vmem_limit,
            ),
        )(x, *flat)

    try:
        out = _run(True)
    except Exception:
        # Older Pallas without pipeline_mode / Buffered(1): default buffering.
        out = _run(False)

    return out[0, :B].reshape(B, 1)


# ----------------------------------------------------------------------------
# Pure-JAX reference (eval-mode semantics of the PyTorch module)
# ----------------------------------------------------------------------------
def reference_forward(x, raw):
    h = x.astype(jnp.float32)
    for layer in raw["hidden"]:
        h = h @ layer["w"] + layer["b"]
        h = jnp.maximum(h, 0.0)
        inv = 1.0 / jnp.sqrt(layer["var"] + BN_EPS)
        h = layer["gamma"] * (h - layer["mean"]) * inv + layer["beta"]
        # Dropout(0.2) is identity in eval mode.
    w_out, b_out = raw["out"]
    # 1-wide head written as an explicit f32 contraction (mathematically the same
    # Linear) so the comparison is not sensitive to XLA's default matmul precision.
    return jnp.sum(h * w_out[:, 0][None, :], axis=-1, keepdims=True) + b_out


if __name__ == "__main__":
    batch = 8
    input_dim = 16
    hidden_dims = [32, 32]

    key = jax.random.PRNGKey(0)
    key, kx = jax.random.split(key)
    x = jax.random.normal(kx, (batch, input_dim), jnp.float32)
    raw = init_params(key, input_dim, hidden_dims)

    ref = reference_forward(x, raw)

    # f32 MXU operands.
    prepared_f32 = prepare_params(raw, compute_dtype=jnp.float32)
    out = jax.block_until_ready(metabolic_cost_net_forward(x, prepared_f32))
    assert out.shape == (batch, 1), out.shape
    assert jnp.allclose(out, ref, atol=1e-5, rtol=1e-5), (
        f"f32 mismatch: max abs diff {jnp.max(jnp.abs(out - ref))}")

    # bf16 MXU operands (valid on v5e/v6e/v7x), f32 accumulation + f32 BN/head.
    prepared_bf16 = prepare_params(raw, compute_dtype=jnp.bfloat16)
    out_bf16 = jax.block_until_ready(metabolic_cost_net_forward(x, prepared_bf16))
    assert out_bf16.shape == (batch, 1), out_bf16.shape
    assert jnp.allclose(out_bf16, ref, atol=5e-2, rtol=5e-2), (
        f"bf16 mismatch: max abs diff {jnp.max(jnp.abs(out_bf16 - ref))}")

    # Multi-tile path with a partial tail block (B not a multiple of the tile;
    # no wrapper-side padding of x).
    x2 = jax.random.normal(jax.random.PRNGKey(1), (300, input_dim), jnp.float32)
    ref2 = reference_forward(x2, raw)
    out2 = jax.block_until_ready(metabolic_cost_net_forward(x2, prepared_f32))
    assert out2.shape == (300, 1), out2.shape
    assert jnp.allclose(out2, ref2, atol=1e-5, rtol=1e-5), (
        f"multi-tile mismatch: max abs diff {jnp.max(jnp.abs(out2 - ref2))}")

    print("KERNEL_OK")
</pallas_src>

<mosaic_0001>
module attributes {stable_mosaic.version = 11 : i64} {
  func.func @kernel(%arg0: i32, %arg1: memref<8x16xf32, #tpu.memory_space<vmem>>, %arg2: memref<16x128xf32, #tpu.memory_space<vmem>>, %arg3: memref<1x128xf32, #tpu.memory_space<vmem>>, %arg4: memref<1x128xf32, #tpu.memory_space<vmem>>, %arg5: memref<1x128xf32, #tpu.memory_space<vmem>>, %arg6: memref<128x128xf32, #tpu.memory_space<vmem>>, %arg7: memref<1x128xf32, #tpu.memory_space<vmem>>, %arg8: memref<1x128xf32, #tpu.memory_space<vmem>>, %arg9: memref<1x128xf32, #tpu.memory_space<vmem>>, %arg10: memref<1x128xf32, #tpu.memory_space<vmem>>, %arg11: memref<1x1xf32, #tpu.memory_space<vmem>>, %arg12: memref<1x8xf32, #tpu.memory_space<vmem>>) attributes {dimension_semantics = [#tpu.dimension_semantics<parallel>], iteration_bounds = array<i64: 1>, scalar_prefetch = 0 : i64, scratch_operands = 0 : i64, tpu.core_type = #tpu.core_type<tc>, window_params = [{transform_indices = @transform_0, window_bounds = array<i64: 8, 16>}, {pipeline_mode = #tpu.pipeline_mode<synchronous>, transform_indices = @transform_1, window_bounds = array<i64: 16, 128>}, {pipeline_mode = #tpu.pipeline_mode<synchronous>, transform_indices = @transform_2, window_bounds = array<i64: 1, 128>}, {pipeline_mode = #tpu.pipeline_mode<synchronous>, transform_indices = @transform_3, window_bounds = array<i64: 1, 128>}, {pipeline_mode = #tpu.pipeline_mode<synchronous>, transform_indices = @transform_4, window_bounds = array<i64: 1, 128>}, {pipeline_mode = #tpu.pipeline_mode<synchronous>, transform_indices = @transform_5, window_bounds = array<i64: 128, 128>}, {pipeline_mode = #tpu.pipeline_mode<synchronous>, transform_indices = @transform_6, window_bounds = array<i64: 1, 128>}, {pipeline_mode = #tpu.pipeline_mode<synchronous>, transform_indices = @transform_7, window_bounds = array<i64: 1, 128>}, {pipeline_mode = #tpu.pipeline_mode<synchronous>, transform_indices = @transform_8, window_bounds = array<i64: 1, 128>}, {pipeline_mode = #tpu.pipeline_mode<synchronous>, transform_indices = @transform_9, window_bounds = array<i64: 1, 128>}, {pipeline_mode = #tpu.pipeline_mode<synchronous>, transform_indices = @transform_10, window_bounds = array<i64: 1, 1>}, {transform_indices = @transform_11, window_bounds = array<i64: 1, 8>}]} {
    %c0 = arith.constant 0 : index
    %c0_0 = arith.constant 0 : index
    %0 = vector.load %arg1[%c0, %c0_0] : memref<8x16xf32, #tpu.memory_space<vmem>>, vector<8x16xf32>
    %c0_1 = arith.constant 0 : index
    %c0_2 = arith.constant 0 : index
    %1 = vector.load %arg2[%c0_1, %c0_2] : memref<16x128xf32, #tpu.memory_space<vmem>>, vector<16x128xf32>
    %c0_3 = arith.constant 0 : index
    %c0_4 = arith.constant 0 : index
    %2 = vector.load %arg3[%c0_3, %c0_4] : memref<1x128xf32, #tpu.memory_space<vmem>>, vector<1x128xf32>
    %c0_5 = arith.constant 0 : index
    %c0_6 = arith.constant 0 : index
    %3 = vector.load %arg4[%c0_5, %c0_6] : memref<1x128xf32, #tpu.memory_space<vmem>>, vector<1x128xf32>
    %c0_7 = arith.constant 0 : index
    %c0_8 = arith.constant 0 : index
    %4 = vector.load %arg5[%c0_7, %c0_8] : memref<1x128xf32, #tpu.memory_space<vmem>>, vector<1x128xf32>
    %cst = arith.constant dense<0.000000e+00> : vector<8x128xf32>
    %5 = tpu.matmul %0, %1, %cst {dimension_numbers = #tpu.dot_dimension_numbers<[1], [0], [0], [1], [0, 0, 1, 1], [], []>} : vector<8x16xf32>, vector<16x128xf32>, vector<8x128xf32> -> vector<8x128xf32>
    %6 = vector.broadcast %2 : vector<1x128xf32> to vector<8x128xf32>
    %7 = arith.addf %5, %6 : vector<8x128xf32>
    %cst_9 = arith.constant 0.000000e+00 : f32
    %8 = vector.broadcast %cst_9 : f32 to vector<8x128xf32>
    %9 = arith.maximumf %7, %8 : vector<8x128xf32>
    %10 = vector.broadcast %3 : vector<1x128xf32> to vector<8x128xf32>
    %11 = arith.mulf %9, %10 : vector<8x128xf32>
    %12 = vector.broadcast %4 : vector<1x128xf32> to vector<8x128xf32>
    %13 = arith.addf %11, %12 : vector<8x128xf32>
    %c0_10 = arith.constant 0 : index
    %c0_11 = arith.constant 0 : index
    %14 = vector.load %arg6[%c0_10, %c0_11] : memref<128x128xf32, #tpu.memory_space<vmem>>, vector<128x128xf32>
    %c0_12 = arith.constant 0 : index
    %c0_13 = arith.constant 0 : index
    %15 = vector.load %arg7[%c0_12, %c0_13] : memref<1x128xf32, #tpu.memory_space<vmem>>, vector<1x128xf32>
    %c0_14 = arith.constant 0 : index
    %c0_15 = arith.constant 0 : index
    %16 = vector.load %arg8[%c0_14, %c0_15] : memref<1x128xf32, #tpu.memory_space<vmem>>, vector<1x128xf32>
    %c0_16 = arith.constant 0 : index
    %c0_17 = arith.constant 0 : index
    %17 = vector.load %arg9[%c0_16, %c0_17] : memref<1x128xf32, #tpu.memory_space<vmem>>, vector<1x128xf32>
    %cst_18 = arith.constant dense<0.000000e+00> : vector<8x128xf32>
    %18 = tpu.matmul %13, %14, %cst_18 {dimension_numbers = #tpu.dot_dimension_numbers<[1], [0], [0], [1], [0, 0, 1, 1], [], []>} : vector<8x128xf32>, vector<128x128xf32>, vector<8x128xf32> -> vector<8x128xf32>
    %19 = vector.broadcast %15 : vector<1x128xf32> to vector<8x128xf32>
    %20 = arith.addf %18, %19 : vector<8x128xf32>
    %cst_19 = arith.constant 0.000000e+00 : f32
    %21 = vector.broadcast %cst_19 : f32 to vector<8x128xf32>
    %22 = arith.maximumf %20, %21 : vector<8x128xf32>
    %23 = vector.broadcast %16 : vector<1x128xf32> to vector<8x128xf32>
    %24 = arith.mulf %22, %23 : vector<8x128xf32>
    %25 = vector.broadcast %17 : vector<1x128xf32> to vector<8x128xf32>
    %26 = arith.addf %24, %25 : vector<8x128xf32>
    %c0_20 = arith.constant 0 : index
    %c0_21 = arith.constant 0 : index
    %27 = vector.load %arg10[%c0_20, %c0_21] : memref<1x128xf32, #tpu.memory_space<vmem>>, vector<1x128xf32>
    %c0_22 = arith.constant 0 : index
    %c0_23 = arith.constant 0 : index
    %28 = vector.load %arg11[%c0_22, %c0_23] : memref<1x1xf32, #tpu.memory_space<vmem>>, vector<1x1xf32>
    %29 = vector.broadcast %27 : vector<1x128xf32> to vector<8x128xf32>
    %30 = arith.mulf %26, %29 : vector<8x128xf32>
    %cst_24 = arith.constant dense<0.000000e+00> : vector<8xf32>
    %31 = vector.multi_reduction <add>, %30, %cst_24 [1] : vector<8x128xf32> to vector<8xf32>
    %32 = vector.shape_cast %31 : vector<8xf32> to vector<8x1xf32>
    %33 = tpu.transpose %32, [1, 0] : vector<8x1xf32> -> vector<1x8xf32>
    %34 = vector.broadcast %28 : vector<1x1xf32> to vector<1x8xf32>
    %35 = arith.addf %33, %34 : vector<1x8xf32>
    %c0_25 = arith.constant 0 : index
    %c0_26 = arith.constant 0 : index
    %36 = vector.load %arg12[%c0_25, %c0_26] : memref<1x8xf32, #tpu.memory_space<vmem>>, vector<1x8xf32>
    tpu.vector_store %arg12[%c0_25, %c0_26], %35 {strides = array<i32>} : memref<1x8xf32, #tpu.memory_space<vmem>>, vector<1x8xf32>,
    return
  }
  func.func @transform_0(%arg0: i32) -> (i32, i32) {
    %c0_i32 = arith.constant 0 : i32
    %c0_i32_0 = arith.constant 0 : i32
    return %arg0, %c0_i32 : i32, i32
  }
  func.func @transform_1(%arg0: i32) -> (i32, i32) {
    %c0_i32 = arith.constant 0 : i32
    %c0_i32_0 = arith.constant 0 : i32
    %c0_i32_1 = arith.constant 0 : i32
    return %c0_i32, %c0_i32_0 : i32, i32
  }
  func.func @transform_2(%arg0: i32) -> (i32, i32) {
    %c0_i32 = arith.constant 0 : i32
    %c0_i32_0 = arith.constant 0 : i32
    %c0_i32_1 = arith.constant 0 : i32
    return %c0_i32, %c0_i32_0 : i32, i32
  }
  func.func @transform_3(%arg0: i32) -> (i32, i32) {
    %c0_i32 = arith.constant 0 : i32
    %c0_i32_0 = arith.constant 0 : i32
    %c0_i32_1 = arith.constant 0 : i32
    return %c0_i32, %c0_i32_0 : i32, i32
  }
  func.func @transform_4(%arg0: i32) -> (i32, i32) {
    %c0_i32 = arith.constant 0 : i32
    %c0_i32_0 = arith.constant 0 : i32
    %c0_i32_1 = arith.constant 0 : i32
    return %c0_i32, %c0_i32_0 : i32, i32
  }
  func.func @transform_5(%arg0: i32) -> (i32, i32) {
    %c0_i32 = arith.constant 0 : i32
    %c0_i32_0 = arith.constant 0 : i32
    %c0_i32_1 = arith.constant 0 : i32
    return %c0_i32, %c0_i32_0 : i32, i32
  }
  func.func @transform_6(%arg0: i32) -> (i32, i32) {
    %c0_i32 = arith.constant 0 : i32
    %c0_i32_0 = arith.constant 0 : i32
    %c0_i32_1 = arith.constant 0 : i32
    return %c0_i32, %c0_i32_0 : i32, i32
  }
  func.func @transform_7(%arg0: i32) -> (i32, i32) {
    %c0_i32 = arith.constant 0 : i32
    %c0_i32_0 = arith.constant 0 : i32
    %c0_i32_1 = arith.constant 0 : i32
    return %c0_i32, %c0_i32_0 : i32, i32
  }
  func.func @transform_8(%arg0: i32) -> (i32, i32) {
    %c0_i32 = arith.constant 0 : i32
    %c0_i32_0 = arith.constant 0 : i32
    %c0_i32_1 = arith.constant 0 : i32
    return %c0_i32, %c0_i32_0 : i32, i32
  }
  func.func @transform_9(%arg0: i32) -> (i32, i32) {
    %c0_i32 = arith.constant 0 : i32
    %c0_i32_0 = arith.constant 0 : i32
    %c0_i32_1 = arith.constant 0 : i32
    return %c0_i32, %c0_i32_0 : i32, i32
  }
  func.func @transform_10(%arg0: i32) -> (i32, i32) {
    %c0_i32 = arith.constant 0 : i32
    %c0_i32_0 = arith.constant 0 : i32
    %c0_i32_1 = arith.constant 0 : i32
    return %c0_i32, %c0_i32_0 : i32, i32
  }
  func.func @transform_11(%arg0: i32) -> (i32, i32) {
    %c0_i32 = arith.constant 0 : i32
    %c0_i32_0 = arith.constant 0 : i32
    return %c0_i32, %arg0 : i32, i32
  }
}

module attributes {stable_mosaic.version = 11 : i64} {
  func.func @kernel(%arg0: i32, %arg1: memref<8x16xf32, #tpu.memory_space<vmem>>, %arg2: memref<16x128xf32, #tpu.memory_space<vmem>>, %arg3: memref<1x128xf32, #tpu.memory_space<vmem>>, %arg4: memref<1x128xf32, #tpu.memory_space<vmem>>, %arg5: memref<1x128xf32, #tpu.memory_space<vmem>>, %arg6: memref<128x128xf32, #tpu.memory_space<vmem>>, %arg7: memref<1x128xf32, #tpu.memory_space<vmem>>, %arg8: memref<1x128xf32, #tpu.memory_space<vmem>>, %arg9: memref<1x128xf32, #tpu.memory_space<vmem>>, %arg10: memref<1x128xf32, #tpu.memory_space<vmem>>, %arg11: memref<1x1xf32, #tpu.memory_space<vmem>>, %arg12: memref<1x8xf32, #tpu.memory_space<vmem>>) attributes {dimension_semantics = [#tpu.dimension_semantics<parallel>], iteration_bounds = array<i64: 1>, scalar_prefetch = 0 : i64, scratch_operands = 0 : i64, tpu.core_type = #tpu.core_type<tc>, window_params = [{transform_indices = @transform_0, window_bounds = array<i64: 8, 16>}, {pipeline_mode = #tpu.pipeline_mode<synchronous>, transform_indices = @transform_1, window_bounds = array<i64: 16, 128>}, {pipeline_mode = #tpu.pipeline_mode<synchronous>, transform_indices = @transform_2, window_bounds = array<i64: 1, 128>}, {pipeline_mode = #tpu.pipeline_mode<synchronous>, transform_indices = @transform_3, window_bounds = array<i64: 1, 128>}, {pipeline_mode = #tpu.pipeline_mode<synchronous>, transform_indices = @transform_4, window_bounds = array<i64: 1, 128>}, {pipeline_mode = #tpu.pipeline_mode<synchronous>, transform_indices = @transform_5, window_bounds = array<i64: 128, 128>}, {pipeline_mode = #tpu.pipeline_mode<synchronous>, transform_indices = @transform_6, window_bounds = array<i64: 1, 128>}, {pipeline_mode = #tpu.pipeline_mode<synchronous>, transform_indices = @transform_7, window_bounds = array<i64: 1, 128>}, {pipeline_mode = #tpu.pipeline_mode<synchronous>, transform_indices = @transform_8, window_bounds = array<i64: 1, 128>}, {pipeline_mode = #tpu.pipeline_mode<synchronous>, transform_indices = @transform_9, window_bounds = array<i64: 1, 128>}, {pipeline_mode = #tpu.pipeline_mode<synchronous>, transform_indices = @transform_10, window_bounds = array<i64: 1, 1>}, {transform_indices = @transform_11, window_bounds = array<i64: 1, 8>}]} {
    %c0 = arith.constant 0 : index
    %c0_0 = arith.constant 0 : index
    %0 = vector.load %arg1[%c0, %c0_0] : memref<8x16xf32, #tpu.memory_space<vmem>>, vector<8x16xf32>
    %c0_1 = arith.constant 0 : index
    %c0_2 = arith.constant 0 : index
    %1 = vector.load %arg2[%c0_1, %c0_2] : memref<16x128xf32, #tpu.memory_space<vmem>>, vector<16x128xf32>
    %c0_3 = arith.constant 0 : index
    %c0_4 = arith.constant 0 : index
    %2 = vector.load %arg3[%c0_3, %c0_4] : memref<1x128xf32, #tpu.memory_space<vmem>>, vector<1x128xf32>
    %c0_5 = arith.constant 0 : index
    %c0_6 = arith.constant 0 : index
    %3 = vector.load %arg4[%c0_5, %c0_6] : memref<1x128xf32, #tpu.memory_space<vmem>>, vector<1x128xf32>
    %c0_7 = arith.constant 0 : index
    %c0_8 = arith.constant 0 : index
    %4 = vector.load %arg5[%c0_7, %c0_8] : memref<1x128xf32, #tpu.memory_space<vmem>>, vector<1x128xf32>
    %cst = arith.constant dense<0.000000e+00> : vector<8x128xf32>
    %5 = tpu.matmul %0, %1, %cst {dimension_numbers = #tpu.dot_dimension_numbers<[1], [0], [0], [1], [0, 0, 1, 1], [], []>} : vector<8x16xf32>, vector<16x128xf32>, vector<8x128xf32> -> vector<8x128xf32>
    %6 = vector.broadcast %2 : vector<1x128xf32> to vector<8x128xf32>
    %7 = arith.addf %5, %6 : vector<8x128xf32>
    %cst_9 = arith.constant 0.000000e+00 : f32
    %8 = vector.broadcast %cst_9 : f32 to vector<8x128xf32>
    %9 = arith.maximumf %7, %8 : vector<8x128xf32>
    %10 = vector.broadcast %3 : vector<1x128xf32> to vector<8x128xf32>
    %11 = arith.mulf %9, %10 : vector<8x128xf32>
    %12 = vector.broadcast %4 : vector<1x128xf32> to vector<8x128xf32>
    %13 = arith.addf %11, %12 : vector<8x128xf32>
    %c0_10 = arith.constant 0 : index
    %c0_11 = arith.constant 0 : index
    %14 = vector.load %arg6[%c0_10, %c0_11] : memref<128x128xf32, #tpu.memory_space<vmem>>, vector<128x128xf32>
    %c0_12 = arith.constant 0 : index
    %c0_13 = arith.constant 0 : index
    %15 = vector.load %arg7[%c0_12, %c0_13] : memref<1x128xf32, #tpu.memory_space<vmem>>, vector<1x128xf32>
    %c0_14 = arith.constant 0 : index
    %c0_15 = arith.constant 0 : index
    %16 = vector.load %arg8[%c0_14, %c0_15] : memref<1x128xf32, #tpu.memory_space<vmem>>, vector<1x128xf32>
    %c0_16 = arith.constant 0 : index
    %c0_17 = arith.constant 0 : index
    %17 = vector.load %arg9[%c0_16, %c0_17] : memref<1x128xf32, #tpu.memory_space<vmem>>, vector<1x128xf32>
    %cst_18 = arith.constant dense<0.000000e+00> : vector<8x128xf32>
    %18 = tpu.matmul %13, %14, %cst_18 {dimension_numbers = #tpu.dot_dimension_numbers<[1], [0], [0], [1], [0, 0, 1, 1], [], []>} : vector<8x128xf32>, vector<128x128xf32>, vector<8x128xf32> -> vector<8x128xf32>
    %19 = vector.broadcast %15 : vector<1x128xf32> to vector<8x128xf32>
    %20 = arith.addf %18, %19 : vector<8x128xf32>
    %cst_19 = arith.constant 0.000000e+00 : f32
    %21 = vector.broadcast %cst_19 : f32 to vector<8x128xf32>
    %22 = arith.maximumf %20, %21 : vector<8x128xf32>
    %23 = vector.broadcast %16 : vector<1x128xf32> to vector<8x128xf32>
    %24 = arith.mulf %22, %23 : vector<8x128xf32>
    %25 = vector.broadcast %17 : vector<1x128xf32> to vector<8x128xf32>
    %26 = arith.addf %24, %25 : vector<8x128xf32>
    %c0_20 = arith.constant 0 : index
    %c0_21 = arith.constant 0 : index
    %27 = vector.load %arg10[%c0_20, %c0_21] : memref<1x128xf32, #tpu.memory_space<vmem>>, vector<1x128xf32>
    %c0_22 = arith.constant 0 : index
    %c0_23 = arith.constant 0 : index
    %28 = vector.load %arg11[%c0_22, %c0_23] : memref<1x1xf32, #tpu.memory_space<vmem>>, vector<1x1xf32>
    %29 = vector.broadcast %27 : vector<1x128xf32> to vector<8x128xf32>
    %30 = arith.mulf %26, %29 : vector<8x128xf32>
    %cst_24 = arith.constant dense<0.000000e+00> : vector<8xf32>
    %31 = vector.multi_reduction <add>, %30, %cst_24 [1] : vector<8x128xf32> to vector<8xf32>
    %32 = vector.shape_cast %31 : vector<8xf32> to vector<8x1xf32>
    %33 = tpu.transpose %32, [1, 0] : vector<8x1xf32> -> vector<1x8xf32>
    %34 = vector.broadcast %28 : vector<1x1xf32> to vector<1x8xf32>
    %35 = arith.addf %33, %34 : vector<1x8xf32>
    %c0_25 = arith.constant 0 : index
    %c0_26 = arith.constant 0 : index
    %36 = vector.load %arg12[%c0_25, %c0_26] : memref<1x8xf32, #tpu.memory_space<vmem>>, vector<1x8xf32>
    tpu.vector_store %arg12[%c0_25, %c0_26], %35 {strides = array<i32>} : memref<1x8xf32, #tpu.memory_space<vmem>>, vector<1x8xf32>,
    return
  }
  func.func @transform_0(%arg0: i32) -> (i32, i32) {
    %c0_i32 = arith.constant 0 : i32
    %c0_i32_0 = arith.constant 0 : i32
    return %arg0, %c0_i32 : i32, i32
  }
  func.func @transform_1(%arg0: i32) -> (i32, i32) {
    %c0_i32 = arith.constant 0 : i32
    %c0_i32_0 = arith.constant 0 : i32
    %c0_i32_1 = arith.constant 0 : i32
    return %c0_i32, %c0_i32_0 : i32, i32
  }
  func.func @transform_2(%arg0: i32) -> (i32, i32) {
    %c0_i32 = arith.constant 0 : i32
    %c0_i32_0 = arith.constant 0 : i32
    %c0_i32_1 = arith.constant 0 : i32
    return %c0_i32, %c0_i32_0 : i32, i32
  }
  func.func @transform_3(%arg0: i32) -> (i32, i32) {
    %c0_i32 = arith.constant 0 : i32
    %c0_i32_0 = arith.constant 0 : i32
    %c0_i32_1 = arith.constant 0 : i32
    return %c0_i32, %c0_i32_0 : i32, i32
  }
  func.func @transform_4(%arg0: i32) -> (i32, i32) {
    %c0_i32 = arith.constant 0 : i32
    %c0_i32_0 = arith.constant 0 : i32
    %c0_i32_1 = arith.constant 0 : i32
    return %c0_i32, %c0_i32_0 : i32, i32
  }
  func.func @transform_5(%arg0: i32) -> (i32, i32) {
    %c0_i32 = arith.constant 0 : i32
    %c0_i32_0 = arith.constant 0 : i32
    %c0_i32_1 = arith.constant 0 : i32
    return %c0_i32, %c0_i32_0 : i32, i32
  }
  func.func @transform_6(%arg0: i32) -> (i32, i32) {
    %c0_i32 = arith.constant 0 : i32
    %c0_i32_0 = arith.constant 0 : i32
    %c0_i32_1 = arith.constant 0 : i32
    return %c0_i32, %c0_i32_0 : i32, i32
  }
  func.func @transform_7(%arg0: i32) -> (i32, i32) {
    %c0_i32 = arith.constant 0 : i32
    %c0_i32_0 = arith.constant 0 : i32
    %c0_i32_1 = arith.constant 0 : i32
    return %c0_i32, %c0_i32_0 : i32, i32
  }
  func.func @transform_8(%arg0: i32) -> (i32, i32) {
    %c0_i32 = arith.constant 0 : i32
    %c0_i32_0 = arith.constant 0 : i32
    %c0_i32_1 = arith.constant 0 : i32
    return %c0_i32, %c0_i32_0 : i32, i32
  }
  func.func @transform_9(%arg0: i32) -> (i32, i32) {
    %c0_i32 = arith.constant 0 : i32
    %c0_i32_0 = arith.constant 0 : i32
    %c0_i32_1 = arith.constant 0 : i32
    return %c0_i32, %c0_i32_0 : i32, i32
  }
  func.func @transform_10(%arg0: i32) -> (i32, i32) {
    %c0_i32 = arith.constant 0 : i32
    %c0_i32_0 = arith.constant 0 : i32
    %c0_i32_1 = arith.constant 0 : i32
    return %c0_i32, %c0_i32_0 : i32, i32
  }
  func.func @transform_11(%arg0: i32) -> (i32, i32) {
    %c0_i32 = arith.constant 0 : i32
    %c0_i32_0 = arith.constant 0 : i32
    return %c0_i32, %arg0 : i32, i32
  }
}

</mosaic_0001>

<bundles_post_ra>
// kernel: tpu_custom_call.1
= control target key start
LH: loop header
LB: loop body
LE: loop exit
PB: predicated region body
PF: predicated region fallthrough
CT: control target
= control target key end

     0   :  { %s469_s0 = inlined_call_operand.hbm [shape: f32[8,16], index: 0, kind: input, shape index: {}]   ;;  %s470_s1 = inlined_call_operand.hbm [shape: f32[16,128], index: 1, kind: input, shape index: {}]   ;;  %s471_s2 = inlined_call_operand.vmem [shape: f32[1,128], index: 2, kind: input, shape index: {}]   ;;  %s472_s3 = inlined_call_operand.vmem [shape: f32[1,128], index: 3, kind: input, shape index: {}]   ;;  %s473_s4 = inlined_call_operand.vmem [shape: f32[1,128], index: 4, kind: input, shape index: {}]   ;;  %s474_s5 = inlined_call_operand.hbm [shape: f32[128,128], index: 5, kind: input, shape index: {}]   ;;  %s475_s6 = inlined_call_operand.vmem [shape: f32[1,128], index: 6, kind: input, shape index: {}]   ;;  %s476_s7 = inlined_call_operand.vmem [shape: f32[1,128], index: 7, kind: input, shape index: {}]   ;;  %s477_s8 = inlined_call_operand.vmem [shape: f32[1,128], index: 8, kind: input, shape index: {}]   ;;  %s478_s9 = inlined_call_operand.vmem [shape: f32[1,128], index: 9, kind: input, shape index: {}]   ;;  %s479_s10 = inlined_call_operand.<no memory space> [shape: f32[1,1], index: 10, kind: input, shape index: {}]   ;;  %s480_s11 = inlined_call_operand.hbm [shape: f32[1,8], index: 11, kind: output, shape index: {}]  }
   0x1   :  { %v16_v0 = vstv %s479_s10 }
   0x2   :  { %17 = vst [vmem:[#allocation2] sm:$0x1] %v16_v0 }
   0x3   :  { %18 = vsyncpa [#allocation4], 0 }
   0x4   :  { %19 = vsyncpa [#allocation7], 0  ;;  %s36_s21 = sshll.u32 %s470_s1, 4  ;;  %s37_s21 = int_to_ptr.hbm [resolvable:$true] %s36_s21 }
   0x5   :  { %20 = vsyncpa [#allocation5], 0  ;;  %s366_s22 = smov [#allocation6]   ;;  %s26_s26 = sshll.u32 %s469_s0, 4  ;;  %s27_s26 = int_to_ptr.hbm [resolvable:$true] %s26_s26 }
   0x6   :  { %s38_s23 = sshll.u32 %s366_s22, 4  ;;  %s367_s27 = smov 128   ;;  %s39_s23 = int_to_ptr.vmem [resolvable:$true] %s38_s23 }
   0x7   :  { %s368_s28 = smov 8   ;;  %s369_s10 = smov [#allocation3]  }
   0x8   :  { %44 = dma.hbm_to_vmem [thread:$0]  %s37_s21, 256, %s39_s23, [#allocation7], %s367_s27, %s367_s27, %s368_s28  }
   0x9   :  { %s28_s29 = sshll.u32 %s369_s10, 4  ;;  %s55_s13 = sshll.u32 %s474_s5, 4  ;;  %s29_s29 = int_to_ptr.vmem [resolvable:$true] %s28_s29  ;;  %s56_s13 = int_to_ptr.hbm [resolvable:$true] %s55_s13 }
   0xa   :  { %31 = dma.hbm_to_vmem [thread:$0]  %s27_s26, 128, %s29_s29, [#allocation4]  }
   0xb   :  { %s370_s1 = smov [#allocation8]  }
   0xc   :  { %s57_s14 = sshll.u32 %s370_s1, 4  ;;  %s58_s14 = int_to_ptr.vmem [resolvable:$true] %s57_s14 }
   0xd   :  { %63 = dma.hbm_to_vmem [thread:$0]  %s56_s13, 2048, %s58_s14, [#allocation7], %s367_s27, %s367_s27, %s368_s28  }
   0xe   :  { %360 = dma.done.wait [#allocation4], 128  }
   0xf   :  { %361 = vsyncadd [#allocation4], 4294967168 }
  0x10   :  { %362 = dma.done.wait [#allocation7], 2304  }
  0x11   :  { %363 = vsyncadd [#allocation7], 4294964992  ;;  %v88_v1 = vld [vmem:[#allocation6 + $0x8] sm:$0xff]  ;;  %v87_v2 = vld [vmem:[#allocation6] sm:$0xff]  ;;  %vm95_vm0 = vcmask 130048   ;;  %v371_v39 = vmov 0  }
  0x12   :  { %113 = vmatpush.msra.mxu0 %v88_v1  ;;  %v86_v3 = vld [vmem:[#allocation3] sm:$0xff]  ;;  %v143_v4 = vld [vmem:[#allocation8 + $0x78] sm:$0xff]  ;;  %v142_v5 = vld [vmem:[#allocation8 + $0x70] sm:$0xff]  ;;  %255 = vset.pattern.permute.xlu1 %v371_v39  ;;  %s235_s25 = sshll.u32 %s480_s11, 4  ;;  %vm226_vm1 = vcmask 57344   ;;  %s236_s25 = int_to_ptr.hbm [resolvable:$true] %s235_s25 }
  0x13   :  { %150 = vmatpush.msra.mxu1 %v143_v4  ;;  %v141_v6 = vld [vmem:[#allocation8 + $0x68] sm:$0xff]  ;;  %v140_v7 = vld [vmem:[#allocation8 + $0x60] sm:$0xff]  ;;  %v139_v8 = vld [vmem:[#allocation8 + $0x58] sm:$0xff] }
  0x14   :  { %114 = vmatpush.msra.mxu0 %v87_v2  ;;  %v138_v9 = vld [vmem:[#allocation8 + $0x50] sm:$0xff]  ;;  %v137_v10 = vld [vmem:[#allocation8 + $0x48] sm:$0xff]  ;;  %v136_v11 = vld [vmem:[#allocation8 + $0x40] sm:$0xff] }
  0x15   :  { %246 = vmatmul.msk.f32.vlgmr.msra.gmra.mxu0 %vm95_vm0, %v86_v3  ;;  %151 = vmatpush.msra.mxu1 %v142_v5  ;;  %v135_v12 = vld [vmem:[#allocation8 + $0x38] sm:$0xff]  ;;  %v134_v13 = vld [vmem:[#allocation8 + $0x30] sm:$0xff]  ;;  %v133_v14 = vld [vmem:[#allocation8 + $0x28] sm:$0xff] }
  0x16   :  { %v132_v15 = vld [vmem:[#allocation8 + $0x20] sm:$0xff]  ;;  %v131_v16 = vld [vmem:[#allocation8 + $0x18] sm:$0xff]  ;;  %v130_v17 = vld [vmem:[#allocation8 + $0x10] sm:$0xff] }
  0x17   :  { %152 = vmatpush.msra.mxu1 %v141_v6  ;;  %v129_v18 = vld [vmem:[#allocation8 + $0x8] sm:$0xff]  ;;  %v128_v19 = vld [vmem:[#allocation8] sm:$0xff] }
  0x18   :  { %v257_v20 = vld [vmem:[%s471_s2] ss:$0 sm:$0xff] }
  0x19   :  { %153 = vmatpush.msra.mxu1 %v140_v7  ;;  %v258_v23 = vld [vmem:[%s472_s3] ss:$0 sm:$0xff] }
  0x1a   :  { %v259_v25 = vld [vmem:[%s473_s4] ss:$0 sm:$0xff] }
  0x1b   :  { %154 = vmatpush.msra.mxu1 %v139_v8  ;;  %v260_v28 = vld [vmem:[%s475_s6] ss:$0 sm:$0xff]  ;;  %s372_s6 = smov [#allocation9]  }
  0x1c   :  { %v261_v31 = vld [vmem:[%s476_s7] ss:$0 sm:$0xff]  ;;  %s233_s7 = sshll.u32 %s372_s6, 4  ;;  %s234_s7 = int_to_ptr.vmem [resolvable:$true] %s233_s7 }
  0x1d   :  { %155 = vmatpush.msra.mxu1 %v138_v9  ;;  %v262_v33 = vld [vmem:[%s477_s8] ss:$0 sm:$0xff] }
  0x1e   :  { %v263_v35 = vld [vmem:[%s478_s9] ss:$0 sm:$0xff] }
  0x1f   :  { %156 = vmatpush.msra.mxu1 %v137_v10  ;;  %v180_v38 = vld [vmem:[#allocation2] sm:$0x1] }
  0x20   :  { %221 = vperm.xlu1 %255, %v180_v38  }
  0x21   :  { %157 = vmatpush.msra.mxu1 %v136_v11 }
  0x23   :  { %158 = vmatpush.msra.mxu1 %v135_v12 }
  0x25   :  { %159 = vmatpush.msra.mxu1 %v134_v13 }
  0x27   :  { %160 = vmatpush.msra.mxu1 %v133_v14 }
  0x29   :  { %161 = vmatpush.msra.mxu1 %v132_v15 }
  0x2b   :  { %162 = vmatpush.msra.mxu1 %v131_v16 }
  0x2d   :  { %163 = vmatpush.msra.mxu1 %v130_v17 }
  0x2f   :  { %164 = vmatpush.msra.mxu1 %v129_v18 }
  0x31   :  { %165 = vmatpush.msra.mxu1 %v128_v19 }
  0x92   :  { %v116_v21 = vpop.f32.mrf.mxu0  ;;  %v222_v41 = vpop.permute.xlu1 %221 }
  0x93   :  { %v117_v22 = vadd.f32 %v257_v20, %v116_v21  ;;  %v224_v42 = vperm.slane %v222_v41, 0 }
  0x95   :  { %v119_v24 = vmax.f32 %v117_v22, 0.0 }
  0x97   :  { %v123_v26 = vmul.f32 %v258_v23, %v119_v24 }
  0x99   :  { %v127_v27 = vadd.f32 %v259_v25, %v123_v26 }
  0x9b   :  { %166 = vmatmul.f32.vlgmr.msra.gmra.mxu1 %v127_v27 }
 0x118   :  { %v167_v29 = vpop.f32.mrf.mxu1 }
 0x119   :  { %v168_v30 = vadd.f32 %v260_v28, %v167_v29 }
 0x11b   :  { %v170_v32 = vmax.f32 %v168_v30, 0.0 }
 0x11d   :  { %v174_v34 = vmul.f32 %v261_v31, %v170_v32 }
 0x11f   :  { %v178_v36 = vadd.f32 %v262_v33, %v174_v34 }
 0x121   :  { %v184_v37 = vmul.f32 %v263_v35, %v178_v36 }
 0x123   :  { %185 = vadd.xlane.f32.xlu0 %v184_v37 }
 0x196   :  { %v186_v40 = vpop.xlane.xlu0 %185 }
 0x197   :  { %187 = vxpose.xlu0.b32.start.end [1/1] (short) (narrow) %v186_v40, 8 }
 0x1fe   :  { %256 = vset.pattern.permute.xlu0 %v371_v39 }
 0x23b   :  { %v203_v43 = vpop.trf.xlu0 }
 0x23c   :  { %v225_v44 = vadd.f32 %v224_v42, %v203_v43 }
 0x23e   :  { %227 = vst.msk [vmem:[#allocation9] sm:$0x1] %vm226_vm1, %v225_v44 }
 0x23f   :  { %238 = dma.vmem_to_hbm [thread:$0]  %s234_s7, 16, %s236_s25, [#allocation5]  }
 0x240   :  { %364 = dma.done.wait [#allocation5], 16  }
 0x241   :  { %365 = vsyncadd [#allocation5], 4294967280 }
 0x242   :  { %243 = vsyncpa [#allocation4], 1 }
 0x243   :  { %244 = vsyncpa [#allocation7], 1 }
 0x244   :  { %245 = vsyncpa [#allocation5], 1 }

// kernel: tpu_custom_call.1
= control target key start
LH: loop header
LB: loop body
LE: loop exit
PB: predicated region body
PF: predicated region fallthrough
CT: control target
= control target key end

     0   :  { %s469_s0 = inlined_call_operand.hbm [shape: f32[8,16], index: 0, kind: input, shape index: {}]   ;;  %s470_s1 = inlined_call_operand.hbm [shape: f32[16,128], index: 1, kind: input, shape index: {}]   ;;  %s471_s2 = inlined_call_operand.vmem [shape: f32[1,128], index: 2, kind: input, shape index: {}]   ;;  %s472_s3 = inlined_call_operand.vmem [shape: f32[1,128], index: 3, kind: input, shape index: {}]   ;;  %s473_s4 = inlined_call_operand.vmem [shape: f32[1,128], index: 4, kind: input, shape index: {}]   ;;  %s474_s5 = inlined_call_operand.hbm [shape: f32[128,128], index: 5, kind: input, shape index: {}]   ;;  %s475_s6 = inlined_call_operand.vmem [shape: f32[1,128], index: 6, kind: input, shape index: {}]   ;;  %s476_s7 = inlined_call_operand.vmem [shape: f32[1,128], index: 7, kind: input, shape index: {}]   ;;  %s477_s8 = inlined_call_operand.vmem [shape: f32[1,128], index: 8, kind: input, shape index: {}]   ;;  %s478_s9 = inlined_call_operand.vmem [shape: f32[1,128], index: 9, kind: input, shape index: {}]   ;;  %s479_s10 = inlined_call_operand.<no memory space> [shape: f32[1,1], index: 10, kind: input, shape index: {}]   ;;  %s480_s11 = inlined_call_operand.hbm [shape: f32[1,8], index: 11, kind: output, shape index: {}]  }
   0x1   :  { %v16_v0 = vstv %s479_s10 }
   0x2   :  { %17 = vst [vmem:[#allocation2] sm:$0x1] %v16_v0 }
   0x3   :  { %18 = vsyncpa [#allocation4], 0 }
   0x4   :  { %19 = vsyncpa [#allocation7], 0  ;;  %s36_s21 = sshll.u32 %s470_s1, 4  ;;  %s37_s21 = int_to_ptr.hbm [resolvable:$true] %s36_s21 }
   0x5   :  { %20 = vsyncpa [#allocation5], 0  ;;  %s366_s22 = smov [#allocation6]   ;;  %s26_s26 = sshll.u32 %s469_s0, 4  ;;  %s27_s26 = int_to_ptr.hbm [resolvable:$true] %s26_s26 }
   0x6   :  { %s38_s23 = sshll.u32 %s366_s22, 4  ;;  %s367_s27 = smov 128   ;;  %s39_s23 = int_to_ptr.vmem [resolvable:$true] %s38_s23 }
   0x7   :  { %s368_s28 = smov 8   ;;  %s369_s10 = smov [#allocation3]  }
   0x8   :  { %44 = dma.hbm_to_vmem [thread:$0]  %s37_s21, 256, %s39_s23, [#allocation7], %s367_s27, %s367_s27, %s368_s28  }
   0x9   :  { %s28_s29 = sshll.u32 %s369_s10, 4  ;;  %s55_s13 = sshll.u32 %s474_s5, 4  ;;  %s29_s29 = int_to_ptr.vmem [resolvable:$true] %s28_s29  ;;  %s56_s13 = int_to_ptr.hbm [resolvable:$true] %s55_s13 }
   0xa   :  { %31 = dma.hbm_to_vmem [thread:$0]  %s27_s26, 128, %s29_s29, [#allocation4]  }
   0xb   :  { %s370_s1 = smov [#allocation8]  }
   0xc   :  { %s57_s14 = sshll.u32 %s370_s1, 4  ;;  %s58_s14 = int_to_ptr.vmem [resolvable:$true] %s57_s14 }
   0xd   :  { %63 = dma.hbm_to_vmem [thread:$0]  %s56_s13, 2048, %s58_s14, [#allocation7], %s367_s27, %s367_s27, %s368_s28  }
   0xe   :  { %360 = dma.done.wait [#allocation4], 128  }
   0xf   :  { %361 = vsyncadd [#allocation4], 4294967168 }
  0x10   :  { %362 = dma.done.wait [#allocation7], 2304  }
  0x11   :  { %363 = vsyncadd [#allocation7], 4294964992  ;;  %v88_v1 = vld [vmem:[#allocation6 + $0x8] sm:$0xff]  ;;  %v87_v2 = vld [vmem:[#allocation6] sm:$0xff]  ;;  %vm95_vm0 = vcmask 130048   ;;  %v371_v39 = vmov 0  }
  0x12   :  { %113 = vmatpush.msra.mxu0 %v88_v1  ;;  %v86_v3 = vld [vmem:[#allocation3] sm:$0xff]  ;;  %v143_v4 = vld [vmem:[#allocation8 + $0x78] sm:$0xff]  ;;  %v142_v5 = vld [vmem:[#allocation8 + $0x70] sm:$0xff]  ;;  %255 = vset.pattern.permute.xlu1 %v371_v39  ;;  %s235_s25 = sshll.u32 %s480_s11, 4  ;;  %vm226_vm1 = vcmask 57344   ;;  %s236_s25 = int_to_ptr.hbm [resolvable:$true] %s235_s25 }
  0x13   :  { %150 = vmatpush.msra.mxu1 %v143_v4  ;;  %v141_v6 = vld [vmem:[#allocation8 + $0x68] sm:$0xff]  ;;  %v140_v7 = vld [vmem:[#allocation8 + $0x60] sm:$0xff]  ;;  %v139_v8 = vld [vmem:[#allocation8 + $0x58] sm:$0xff] }
  0x14   :  { %114 = vmatpush.msra.mxu0 %v87_v2  ;;  %v138_v9 = vld [vmem:[#allocation8 + $0x50] sm:$0xff]  ;;  %v137_v10 = vld [vmem:[#allocation8 + $0x48] sm:$0xff]  ;;  %v136_v11 = vld [vmem:[#allocation8 + $0x40] sm:$0xff] }
  0x15   :  { %246 = vmatmul.msk.f32.vlgmr.msra.gmra.mxu0 %vm95_vm0, %v86_v3  ;;  %151 = vmatpush.msra.mxu1 %v142_v5  ;;  %v135_v12 = vld [vmem:[#allocation8 + $0x38] sm:$0xff]  ;;  %v134_v13 = vld [vmem:[#allocation8 + $0x30] sm:$0xff]  ;;  %v133_v14 = vld [vmem:[#allocation8 + $0x28] sm:$0xff] }
  0x16   :  { %v132_v15 = vld [vmem:[#allocation8 + $0x20] sm:$0xff]  ;;  %v131_v16 = vld [vmem:[#allocation8 + $0x18] sm:$0xff]  ;;  %v130_v17 = vld [vmem:[#allocation8 + $0x10] sm:$0xff] }
  0x17   :  { %152 = vmatpush.msra.mxu1 %v141_v6  ;;  %v129_v18 = vld [vmem:[#allocation8 + $0x8] sm:$0xff]  ;;  %v128_v19 = vld [vmem:[#allocation8] sm:$0xff] }
  0x18   :  { %v257_v20 = vld [vmem:[%s471_s2] ss:$0 sm:$0xff] }
  0x19   :  { %153 = vmatpush.msra.mxu1 %v140_v7  ;;  %v258_v23 = vld [vmem:[%s472_s3] ss:$0 sm:$0xff] }
  0x1a   :  { %v259_v25 = vld [vmem:[%s473_s4] ss:$0 sm:$0xff] }
  0x1b   :  { %154 = vmatpush.msra.mxu1 %v139_v8  ;;  %v260_v28 = vld [vmem:[%s475_s6] ss:$0 sm:$0xff]  ;;  %s372_s6 = smov [#allocation9]  }
  0x1c   :  { %v261_v31 = vld [vmem:[%s476_s7] ss:$0 sm:$0xff]  ;;  %s233_s7 = sshll.u32 %s372_s6, 4  ;;  %s234_s7 = int_to_ptr.vmem [resolvable:$true] %s233_s7 }
  0x1d   :  { %155 = vmatpush.msra.mxu1 %v138_v9  ;;  %v262_v33 = vld [vmem:[%s477_s8] ss:$0 sm:$0xff] }
  0x1e   :  { %v263_v35 = vld [vmem:[%s478_s9] ss:$0 sm:$0xff] }
  0x1f   :  { %156 = vmatpush.msra.mxu1 %v137_v10  ;;  %v180_v38 = vld [vmem:[#allocation2] sm:$0x1] }
  0x20   :  { %221 = vperm.xlu1 %255, %v180_v38  }
  0x21   :  { %157 = vmatpush.msra.mxu1 %v136_v11 }
  0x23   :  { %158 = vmatpush.msra.mxu1 %v135_v12 }
  0x25   :  { %159 = vmatpush.msra.mxu1 %v134_v13 }
  0x27   :  { %160 = vmatpush.msra.mxu1 %v133_v14 }
  0x29   :  { %161 = vmatpush.msra.mxu1 %v132_v15 }
  0x2b   :  { %162 = vmatpush.msra.mxu1 %v131_v16 }
  0x2d   :  { %163 = vmatpush.msra.mxu1 %v130_v17 }
  0x2f   :  { %164 = vmatpush.msra.mxu1 %v129_v18 }
  0x31   :  { %165 = vmatpush.msra.mxu1 %v128_v19 }
  0x92   :  { %v116_v21 = vpop.f32.mrf.mxu0  ;;  %v222_v41 = vpop.permute.xlu1 %221 }
  0x93   :  { %v117_v22 = vadd.f32 %v257_v20, %v116_v21  ;;  %v224_v42 = vperm.slane %v222_v41, 0 }
  0x95   :  { %v119_v24 = vmax.f32 %v117_v22, 0.0 }
  0x97   :  { %v123_v26 = vmul.f32 %v258_v23, %v119_v24 }
  0x99   :  { %v127_v27 = vadd.f32 %v259_v25, %v123_v26 }
  0x9b   :  { %166 = vmatmul.f32.vlgmr.msra.gmra.mxu1 %v127_v27 }
 0x118   :  { %v167_v29 = vpop.f32.mrf.mxu1 }
 0x119   :  { %v168_v30 = vadd.f32 %v260_v28, %v167_v29 }
 0x11b   :  { %v170_v32 = vmax.f32 %v168_v30, 0.0 }
 0x11d   :  { %v174_v34 = vmul.f32 %v261_v31, %v170_v32 }
 0x11f   :  { %v178_v36 = vadd.f32 %v262_v33, %v174_v34 }
 0x121   :  { %v184_v37 = vmul.f32 %v263_v35, %v178_v36 }
 0x123   :  { %185 = vadd.xlane.f32.xlu0 %v184_v37 }
 0x196   :  { %v186_v40 = vpop.xlane.xlu0 %185 }
 0x197   :  { %187 = vxpose.xlu0.b32.start.end [1/1] (short) (narrow) %v186_v40, 8 }
 0x1fe   :  { %256 = vset.pattern.permute.xlu0 %v371_v39 }
 0x23b   :  { %v203_v43 = vpop.trf.xlu0 }
 0x23c   :  { %v225_v44 = vadd.f32 %v224_v42, %v203_v43 }
 0x23e   :  { %227 = vst.msk [vmem:[#allocation9] sm:$0x1] %vm226_vm1, %v225_v44 }
 0x23f   :  { %238 = dma.vmem_to_hbm [thread:$0]  %s234_s7, 16, %s236_s25, [#allocation5]  }
 0x240   :  { %364 = dma.done.wait [#allocation5], 16  }
 0x241   :  { %365 = vsyncadd [#allocation5], 4294967280 }
 0x242   :  { %243 = vsyncpa [#allocation4], 1 }
 0x243   :  { %244 = vsyncpa [#allocation7], 1 }
 0x244   :  { %245 = vsyncpa [#allocation5], 1 }

</bundles_post_ra>
